<compile_context>
chip_gen: v7x
topology: tpu7x:2x2x1
jax: 0.10.0
libtpu: 0.0.40
codegen_flags: <defaults>
</compile_context>

<pallas_src>
import math

import jax
import jax.numpy as jnp
from jax.experimental import pallas as pl
from jax.experimental.pallas import tpu as pltpu

_INV_SQRT2 = 0.7071067811865476
_N_PAD = 128  # lane-dense output width


def _round_up(x, m):
    return ((x + m - 1) // m) * m


def _round_down(x, m):
    return (x // m) * m


def _bert_classify_kernel(x_ref, w_ref, b_ref, o_ref):
    # x_ref: (TB, F) f32, w_ref: (F, 128) f32, b_ref: (1, 128) f32, o_ref: (TB, 128)
    x = x_ref[...]
    w = w_ref[...]
    b = b_ref[...]

    # Dropout(p=0.1) in eval mode == identity.
    # Linear: y = x @ W + b (MXU matmul, f32 accumulation). Padded columns of
    # W/b are exactly zero, so padded output lanes are gelu(0) = 0.
    y = jnp.dot(x, w, preferred_element_type=jnp.float32) + b

    # ActivateFun 'gelu': x * 0.5 * (1 + erf(x / sqrt(2)))  (exact erf form).
    g = y * 0.5 * (1.0 + jax.lax.erf(y * _INV_SQRT2))

    o_ref[...] = g.astype(o_ref.dtype)


def prepare_params(w, b):
    """Pad Linear params to lane-dense slabs ONCE per weight value.

    w: (F, n_out) f32 (transposed nn.Linear weight), b: (n_out,) f32
    Returns (w_p (F, 128), b_p (1, 128)) with columns n_out..127 exactly zero.
    """
    F, n_out = w.shape
    w_p = jnp.zeros((F, _N_PAD), dtype=jnp.float32).at[:, :n_out].set(
        w.astype(jnp.float32))
    b_p = jnp.zeros((1, _N_PAD), dtype=jnp.float32).at[0, :n_out].set(
        b.astype(jnp.float32))
    return w_p, b_p


def _pick_batch_tile(B, F, block_b, vmem_budget_bytes):
    """Largest 8-aligned batch tile that fits the VMEM budget, with enough
    grid depth per TensorCore for the double-buffered pipeline."""
    # Resident bytes: x dbl-buf 2*TB*F*4 + out dbl-buf 2*TB*128*4 + weight/bias.
    fixed = F * _N_PAD * 4 + _N_PAD * 4
    per_row = 2 * 4 * (F + _N_PAD)
    tb_budget = max(8, _round_down(max(vmem_budget_bytes - fixed, 0) // per_row, 8))
    TB = max(8, min(_round_down(block_b, 8), tb_budget))
    # Keep >= ~8 grid steps (>= 4 per core on v7x's 2 TCs) so DMA overlaps
    # compute instead of degenerating to prologue+epilogue.
    if pl.cdiv(B, TB) < 8:
        TB = min(TB, max(8, _round_up(pl.cdiv(B, 8), 8)))
    return TB


def bert_classify(x, w_p, b_p, *, n_out=3, block_b=2048,
                  vmem_budget_bytes=20 * 1024 * 1024, out_dtype=jnp.float32):
    """x: (B, F); w_p: (F, 128) padded weight; b_p: (1, 128) padded bias."""
    B, F = x.shape
    TB = _pick_batch_tile(B, F, block_b, vmem_budget_bytes)
    grid = (pl.cdiv(B, TB),)  # ragged last block handled by Pallas masking

    needed = 2 * TB * F * 4 + 2 * TB * _N_PAD * 4 + F * _N_PAD * 4 + _N_PAD * 4
    vmem_limit = min(max(int(needed * 1.25) + (2 << 20), 16 << 20), 48 << 20)

    out = pl.pallas_call(
        _bert_classify_kernel,
        out_shape=jax.ShapeDtypeStruct((B, _N_PAD), out_dtype),
        grid_spec=pl.GridSpec(
            grid=grid,
            in_specs=[
                # x: streamed per batch tile (double-buffered by the pipeline).
                pl.BlockSpec((TB, F), lambda i: (i, 0)),
                # weight / bias: constant block index -> resident in VMEM.
                pl.BlockSpec((F, _N_PAD), lambda i: (0, 0)),
                pl.BlockSpec((1, _N_PAD), lambda i: (0, 0)),
            ],
            out_specs=pl.BlockSpec((TB, _N_PAD), lambda i: (i, 0)),
        ),
        compiler_params=pltpu.CompilerParams(
            dimension_semantics=("parallel",),  # shards across 2 TCs on v7x
            vmem_limit_bytes=vmem_limit,
        ),
    )(x.astype(jnp.float32), w_p, b_p)

    # Fold this slice into the consumer if it can read the padded slab directly.
    return out[:, :n_out]


def reference(x, w, b):
    y = x @ w + b
    return y * 0.5 * (1.0 + jax.lax.erf(y / math.sqrt(2.0)))


if __name__ == "__main__":
    key = jax.random.PRNGKey(0)
    kx, kw, kb = jax.random.split(key, 3)

    batch = 8
    in_feature = 32
    out_feature = 3  # fixed by the module: nn.Linear(in_feature, 3)

    x = jax.random.normal(kx, (batch, in_feature), dtype=jnp.float32)
    # Deterministic parameter init (mimics nn.Linear uniform init bounds).
    bound = 1.0 / math.sqrt(in_feature)
    w = jax.random.uniform(kw, (in_feature, out_feature),
                           minval=-bound, maxval=bound, dtype=jnp.float32)
    b = jax.random.uniform(kb, (out_feature,),
                           minval=-bound, maxval=bound, dtype=jnp.float32)

    # Pad the Linear params once (outside the per-call hot path).
    w_p, b_p = prepare_params(w, b)

    out = bert_classify(x, w_p, b_p, n_out=out_feature)
    out = jax.block_until_ready(out)

    ref = reference(x, w, b)
    assert out.shape == (batch, out_feature)
    assert jnp.allclose(out, ref, atol=1e-5, rtol=1e-5), "mismatch vs reference"

    print("KERNEL_OK")
</pallas_src>

<mosaic_0001>
module attributes {stable_mosaic.version = 11 : i64} {
  func.func @_bert_classify_kernel(%arg0: i32, %arg1: memref<8x32xf32, #tpu.memory_space<vmem>>, %arg2: memref<32x128xf32, #tpu.memory_space<vmem>>, %arg3: memref<1x128xf32, #tpu.memory_space<vmem>>, %arg4: memref<8x128xf32, #tpu.memory_space<vmem>>) attributes {dimension_semantics = [#tpu.dimension_semantics<parallel>], iteration_bounds = array<i64: 1>, scalar_prefetch = 0 : i64, scratch_operands = 0 : i64, tpu.core_type = #tpu.core_type<tc>, window_params = [{transform_indices = @transform_0, window_bounds = array<i64: 8, 32>}, {pipeline_mode = #tpu.pipeline_mode<synchronous>, transform_indices = @transform_1, window_bounds = array<i64: 32, 128>}, {pipeline_mode = #tpu.pipeline_mode<synchronous>, transform_indices = @transform_2, window_bounds = array<i64: 1, 128>}, {transform_indices = @transform_3, window_bounds = array<i64: 8, 128>}]} {
    %c0 = arith.constant 0 : index
    %c0_0 = arith.constant 0 : index
    %0 = vector.load %arg1[%c0, %c0_0] : memref<8x32xf32, #tpu.memory_space<vmem>>, vector<8x32xf32>
    %c0_1 = arith.constant 0 : index
    %c0_2 = arith.constant 0 : index
    %1 = vector.load %arg2[%c0_1, %c0_2] : memref<32x128xf32, #tpu.memory_space<vmem>>, vector<32x128xf32>
    %c0_3 = arith.constant 0 : index
    %c0_4 = arith.constant 0 : index
    %2 = vector.load %arg3[%c0_3, %c0_4] : memref<1x128xf32, #tpu.memory_space<vmem>>, vector<1x128xf32>
    %cst = arith.constant dense<0.000000e+00> : vector<8x128xf32>
    %3 = tpu.matmul %0, %1, %cst {dimension_numbers = #tpu.dot_dimension_numbers<[1], [0], [0], [1], [0, 0, 1, 1], [], []>} : vector<8x32xf32>, vector<32x128xf32>, vector<8x128xf32> -> vector<8x128xf32>
    %4 = vector.broadcast %2 : vector<1x128xf32> to vector<8x128xf32>
    %5 = arith.addf %3, %4 : vector<8x128xf32>
    %cst_5 = arith.constant 5.000000e-01 : f32
    %6 = vector.broadcast %cst_5 : f32 to vector<8x128xf32>
    %7 = arith.mulf %5, %6 : vector<8x128xf32>
    %cst_6 = arith.constant 0.707106769 : f32
    %8 = vector.broadcast %cst_6 : f32 to vector<8x128xf32>
    %9 = arith.mulf %5, %8 : vector<8x128xf32>
    %10 = math.erf %9 : vector<8x128xf32>
    %cst_7 = arith.constant 1.000000e+00 : f32
    %11 = vector.broadcast %cst_7 : f32 to vector<8x128xf32>
    %12 = arith.addf %11, %10 : vector<8x128xf32>
    %13 = arith.mulf %7, %12 : vector<8x128xf32>
    %c0_8 = arith.constant 0 : index
    %c0_9 = arith.constant 0 : index
    %14 = vector.load %arg4[%c0_8, %c0_9] : memref<8x128xf32, #tpu.memory_space<vmem>>, vector<8x128xf32>
    tpu.vector_store %arg4[%c0_8, %c0_9], %13 {strides = array<i32>} : memref<8x128xf32, #tpu.memory_space<vmem>>, vector<8x128xf32>,
    return
  }
  func.func @transform_0(%arg0: i32) -> (i32, i32) {
    %c0_i32 = arith.constant 0 : i32
    %c0_i32_0 = arith.constant 0 : i32
    return %arg0, %c0_i32 : i32, i32
  }
  func.func @transform_1(%arg0: i32) -> (i32, i32) {
    %c0_i32 = arith.constant 0 : i32
    %c0_i32_0 = arith.constant 0 : i32
    %c0_i32_1 = arith.constant 0 : i32
    return %c0_i32, %c0_i32_0 : i32, i32
  }
  func.func @transform_2(%arg0: i32) -> (i32, i32) {
    %c0_i32 = arith.constant 0 : i32
    %c0_i32_0 = arith.constant 0 : i32
    %c0_i32_1 = arith.constant 0 : i32
    return %c0_i32, %c0_i32_0 : i32, i32
  }
  func.func @transform_3(%arg0: i32) -> (i32, i32) {
    %c0_i32 = arith.constant 0 : i32
    %c0_i32_0 = arith.constant 0 : i32
    return %arg0, %c0_i32 : i32, i32
  }
}

</mosaic_0001>

<bundles_post_ra>
// kernel: tpu_custom_call.1
= control target key start
LH: loop header
LB: loop body
LE: loop exit
PB: predicated region body
PF: predicated region fallthrough
CT: control target
= control target key end

     0   :  { %8 = vsyncpa [#allocation3], 0  ;;  %s329_s0 = inlined_call_operand.hbm [shape: f32[8,32], index: 0, kind: input, shape index: {}]   ;;  %s330_s1 = inlined_call_operand.hbm [shape: f32[32,128], index: 1, kind: input, shape index: {}]   ;;  %s331_s2 = inlined_call_operand.vmem [shape: f32[1,128], index: 2, kind: input, shape index: {}]   ;;  %s332_s3 = inlined_call_operand.hbm [shape: f32[8,128], index: 3, kind: output, shape index: {}]  }
   0x1   :  { %9 = vsyncpa [#allocation6], 0 }
   0x2   :  { %10 = vsyncpa [#allocation4], 0  ;;  %s255_s12 = smov [#allocation2]   ;;  %s256_s14 = smov [#allocation5]  }
   0x3   :  { %s17_s13 = sshll.u32 %s255_s12, 4  ;;  %s26_s15 = sshll.u32 %s256_s14, 4  ;;  %s18_s13 = int_to_ptr.vmem [resolvable:$true] %s17_s13  ;;  %s283_s15 = int_to_ptr.vmem [resolvable:$true] %s26_s15 }
   0x4   :  { %s183_s18 = scalar_lea.hbm %s329_s0, 128 }
   0x5   :  { %p184_p0 = scmp.ne.s32.totalorder %s329_s0, %s183_s18  ;;  %p187_p1 = scmp.lt.u32.totalorder %s183_s18, %s329_s0 }
   0x7   :  { %p189_p2 = pnand %p187_p1, %p184_p0 }
   0x9   :  { %192 = shalt.err (!%p189_p2)
}
   0xa   :  { %s193_s23 = scalar_lea.vmem %s18_s13, 128  ;;  %p198_p4 = scmp.lt.s32.totalorder %s18_s13, %s18_s13 }
   0xb   :  { %p194_p3 = scmp.ne.s32.totalorder %s18_s13, %s193_s23  ;;  %p199_p5 = scmp.lt.s32.totalorder %s193_s23, %s193_s23 }
   0xd   :  { %p200_p6 = por %p199_p5, %p198_p4 }
   0xf   :  { %p201_p7 = pnand %p200_p6, %p194_p3 }
  0x11   :  { %204 = shalt.err (!%p201_p7)
}
  0x12   :  { %20 = dma.hbm_to_vmem [thread:$0]  %s329_s0, 128, %s18_s13, [#allocation3]  }
  0x13   :  { %s205_s28 = scalar_lea.hbm %s330_s1, 512 }
  0x14   :  { %p206_p8 = scmp.ne.s32.totalorder %s330_s1, %s205_s28  ;;  %p209_p9 = scmp.lt.u32.totalorder %s205_s28, %s330_s1 }
  0x16   :  { %p211_p10 = pnand %p209_p9, %p206_p8 }
  0x18   :  { %214 = shalt.err (!%p211_p10)
}
  0x19   :  { %s215_s6 = scalar_lea.vmem %s283_s15, 512  ;;  %p220_p12 = scmp.lt.s32.totalorder %s283_s15, %s283_s15 }
  0x1a   :  { %p216_p11 = scmp.ne.s32.totalorder %s283_s15, %s215_s6  ;;  %p221_p13 = scmp.lt.s32.totalorder %s215_s6, %s215_s6 }
  0x1c   :  { %p222_p0 = por %p221_p13, %p220_p12 }
  0x1e   :  { %p223_p1 = pnand %p222_p0, %p216_p11 }
  0x20   :  { %226 = shalt.err (!%p223_p1)
}
  0x21   :  { %s257_s0 = smov 128   ;;  %s258_s7 = smov 8  }
  0x22   :  { %32 = dma.hbm_to_vmem [thread:$0]  %s330_s1, 512, %s283_s15, [#allocation6], %s257_s0, %s257_s0, %s258_s7  }
  0x23   :  { %249 = dma.done.wait [#allocation3], 128  }
  0x24   :  { %250 = vsyncadd [#allocation3], 4294967168 }
  0x25   :  { %251 = dma.done.wait [#allocation6], 512  }
  0x26   :  { %252 = vsyncadd [#allocation6], 4294966784  ;;  %v259_v0 = vmov 0.0|0.0   ;;  %vm260_vm0 = vmmov 0   ;;  %v261_v1 = vmov 0.0   ;;  %v42_v2 = vld [vmem:[#allocation5] sm:$0xff] }
  0x27   :  { %167 = vmatprep.subr.bf16.mxu0 %v259_v0  ;;  %164 = vmatprep.mubr.msk.f32.mxu0 %vm260_vm0, %v261_v1  ;;  %v43_v3 = vld [vmem:[#allocation5 + $0x8] sm:$0xff]  ;;  %v44_v4 = vld [vmem:[#allocation5 + $0x10] sm:$0xff]  ;;  %v45_v6 = vld [vmem:[#allocation5 + $0x18] sm:$0xff]  ;;  %vm53_vm1 = vcmask 261120   ;;  %s262_s11 = smov [#allocation7]  }
  0x28   :  { %v168_v5 = vpack.c.bf16 %v43_v3, %v42_v2  ;;  %v171_v7 = vpack.c.bf16 %v45_v6, %v44_v4  ;;  %v41_v8 = vld [vmem:[#allocation2] sm:$0xff]  ;;  %s139_s12 = sshll.u32 %s262_s11, 4  ;;  %s140_s12 = int_to_ptr.vmem [resolvable:$true] %s139_s12 }
  0x29   :  { %v149_v9 = vld [vmem:[%s331_s2] ss:$0 sm:$0xff]  ;;  %s227_s13 = scalar_lea.vmem %s140_s12, 128  ;;  %p232_p3 = scmp.lt.s32.totalorder %s140_s12, %s140_s12 }
  0x2a   :  { %169 = vmatpush3.bf16.msra.mxu0 %v168_v5  ;;  %p228_p2 = scmp.ne.s32.totalorder %s140_s12, %s227_s13  ;;  %p233_p4 = scmp.lt.s32.totalorder %s227_s13, %s227_s13 }
  0x2b   :  { %170 = vmatprep.subr.bf16.mxu0 %v259_v0 }
  0x2c   :  { %p234_p5 = por %p233_p4, %p232_p3 }
  0x2e   :  { %172 = vmatpush3.bf16.msra.mxu0 %v171_v7  ;;  %p235_p6 = pnand %p234_p5, %p228_p2 }
  0x31   :  { %165 = vmatmul.mubr.msk.f32.vlgmr.msra.gmra.mrb[0].mxu0 %vm53_vm1, %v41_v8 }
 0x104   :  { %v123_v10 = vpop.f32.mrb[0].mxu0 }
 0x105   :  { %v124_v11 = vadd.f32 %v149_v9, %v123_v10  ;;  %v166_v12 = vpop.f32.mrb[1].mxu0 }
 0x107   :  { %v128_v13 = vmul.f32 0.70710677, %v124_v11  ;;  %v127_v15 = vmul.f32 0.5, %v124_v11 }
 0x109   :  { %181 = verf.f32 %v128_v13 }
 0x113   :  { %v182_v14 = vpop.eup %181 }
 0x114   :  { %v130_v16 = vadd.f32 1.0, %v182_v14 }
 0x116   :  { %v131_v17 = vmul.f32 %v130_v16, %v127_v15 }
 0x118   :  { %132 = vst [vmem:[#allocation7] sm:$0xff] %v131_v17 }
 0x119   :  { %238 = shalt.err (!%p235_p6)
}
 0x11a   :  { %s239_s15 = scalar_lea.hbm %s332_s3, 128 }
 0x11b   :  { %p240_p7 = scmp.ne.s32.totalorder %s332_s3, %s239_s15  ;;  %p243_p8 = scmp.lt.u32.totalorder %s239_s15, %s332_s3 }
 0x11d   :  { %p245_p9 = pnand %p243_p8, %p240_p7 }
 0x11f   :  { %248 = shalt.err (!%p245_p9)
}
 0x120   :  { %142 = dma.vmem_to_hbm [thread:$0]  %s140_s12, 128, %s332_s3, [#allocation4]  }
 0x121   :  { %253 = dma.done.wait [#allocation4], 128  }
 0x122   :  { %254 = vsyncadd [#allocation4], 4294967168 }
 0x123   :  { %146 = vsyncpa [#allocation3], 1 }
 0x124   :  { %147 = vsyncpa [#allocation6], 1 }
 0x125   :  { %148 = vsyncpa [#allocation4], 1 }

</bundles_post_ra>
